<compile_context>
chip_gen: v5e
topology: v5e:2x2
jax: 0.10.0
libtpu: 0.0.40
codegen_flags: <defaults>
</compile_context>

<pallas_src>
import jax
import jax.numpy as jnp
from jax import lax
from jax.experimental import pallas as pl
from jax.experimental.pallas import tpu as pltpu


# ----------------------------- small helpers --------------------------------

def _cdiv(a, b):
    return -(-a // b)


def _round_up(a, m):
    return _cdiv(a, m) * m


def _tile(total, max_tile, align):
    """Pick a tile size (multiple of `align`, <= ~max_tile) and the padded total."""
    total_aligned = _round_up(max(total, 1), align)
    n = _cdiv(total_aligned, max_tile)
    tile = _round_up(_cdiv(total_aligned, n), align)
    return tile, tile * n


def _pad2d(a, rows, cols):
    r, c = a.shape
    return jnp.pad(a, ((0, rows - r), (0, cols - c)))


# ------------------------------- the kernel ---------------------------------

def _fused_kernel(x2_ref, xx_ref, gam_ref, gcn_ref, xc_ref, w_ref, bsum_ref,
                  o_ref, acc_ref):
    """One grid step = one (batch tile, C*N tile).  The C*N axis is the
    reduction axis; an f32 VMEM scratch accumulates the projection and the
    output block is written once at the last reduction step."""
    ki = pl.program_id(1)

    @pl.when(ki == 0)
    def _():
        acc_ref[...] = jnp.zeros_like(acc_ref)

    # cross2[b, j] = 2 * <x_b, X_j>   (the factor 2 is folded into x in the
    # wrapper -- exact in bf16).  MXU, f32 accumulation.
    cross2 = lax.dot_general(x2_ref[...], xc_ref[...],
                             (((1,), (1,)), ((), ())),
                             preferred_element_type=jnp.float32)

    # -gamma_j * ||x_b - X_j||^2
    #   = gamma_j * (2<x_b, X_j> - ||x_b||^2) - gamma_j * ||X_j||^2
    arg = gam_ref[...] * (cross2 - xx_ref[...]) - gcn_ref[...]
    arg = jnp.minimum(arg, 0.0)          # guard: ||.||^2 >= 0 despite cancellation
    k = jnp.exp(arg)                     # Gaussian kernel features (EUP), f32

    # Fused linear projection of ALL components at once: k @ W_all.
    acc_ref[...] += jnp.dot(k.astype(w_ref.dtype), w_ref[...],
                            preferred_element_type=jnp.float32)

    @pl.when(ki == pl.num_programs(1) - 1)
    def _():
        o_ref[...] = acc_ref[...] + bsum_ref[...]


# ------------------------------- the wrapper ---------------------------------

def kernelized_layer_multi_comp(x, X, W, b, sigma, *,
                                compute_dtype=jnp.bfloat16,
                                tile_b=256, tile_cn=1024,
                                vmem_limit_bytes=None):
    """
    x     : (B, D)        float32
    X     : (C, N, D)     float32  -- centers of each component
    W     : (C, n_out, N) float32  -- nn.Linear weights of each component
    b     : (C, n_out)    float32  -- nn.Linear biases of each component
    sigma : (C,)          float32  -- Gaussian bandwidth per component
    returns (B, n_out) float32 = sum_c Linear_c(GaussianKernel(x, X_c))
    """
    x = x.astype(jnp.float32)
    X = X.astype(jnp.float32)
    W = W.astype(jnp.float32)
    b = b.astype(jnp.float32)
    sigma = jnp.asarray(sigma, jnp.float32)

    B, D = x.shape
    C, N, _ = X.shape
    n_out = W.shape[1]
    CN = C * N

    gamma = 1.0 / (2.0 * sigma * sigma)                          # (C,)

    # ---- flatten the C components into one contraction axis of length C*N ----
    Xall = X.reshape(CN, D)                                      # (CN, D)
    Wall = jnp.transpose(W, (0, 2, 1)).reshape(CN, n_out)        # (CN, n_out)
    gamma_row = jnp.repeat(gamma, N).reshape(1, CN)              # (1, CN)
    gcn_row = gamma_row * jnp.sum(Xall * Xall, axis=1).reshape(1, CN)
    b_sum = jnp.sum(b, axis=0).reshape(1, n_out)                 # (1, n_out)
    xx = jnp.sum(x * x, axis=1, keepdims=True)                   # (B, 1), f32
    x2 = 2.0 * x                                                 # exact power-of-2 scale

    # ---- tiling / padding: lane-dense output & contraction, aligned batch ----
    tb, B_pad = _tile(B, tile_b, 16)       # 16 covers f32 (8) and bf16 (16) sublanes
    tcn, CN_pad = _tile(CN, tile_cn, 128)
    n_out_pad = _round_up(n_out, 128)

    x2_p = _pad2d(x2.astype(compute_dtype), B_pad, D)
    xx_p = _pad2d(xx, B_pad, 1)
    Xall_p = _pad2d(Xall.astype(compute_dtype), CN_pad, D)
    Wall_p = _pad2d(Wall.astype(compute_dtype), CN_pad, n_out_pad)
    gam_p = _pad2d(gamma_row, 1, CN_pad)
    gcn_p = _pad2d(gcn_row, 1, CN_pad)
    bsum_p = _pad2d(b_sum, 1, n_out_pad)
    # Padded C*N columns: gamma = gcn = 0 and cross = 0 -> k = 1, but the
    # corresponding W rows are 0 so they contribute nothing.

    grid = (B_pad // tb, CN_pad // tcn)

    grid_spec = pltpu.PrefetchScalarGridSpec(
        num_scalar_prefetch=0,
        grid=grid,
        in_specs=[
            pl.BlockSpec((tb, D), lambda bi, ki: (bi, 0)),            # 2*x
            pl.BlockSpec((tb, 1), lambda bi, ki: (bi, 0)),            # ||x||^2
            pl.BlockSpec((1, tcn), lambda bi, ki: (0, ki)),           # gamma per center
            pl.BlockSpec((1, tcn), lambda bi, ki: (0, ki)),           # gamma*||X||^2
            pl.BlockSpec((tcn, D), lambda bi, ki: (ki, 0)),           # fused centers
            pl.BlockSpec((tcn, n_out_pad), lambda bi, ki: (ki, 0)),   # fused weights
            pl.BlockSpec((1, n_out_pad), lambda bi, ki: (0, 0)),      # summed bias
        ],
        out_specs=pl.BlockSpec((tb, n_out_pad), lambda bi, ki: (bi, 0)),
        scratch_shapes=[pltpu.VMEM((tb, n_out_pad), jnp.float32)],
    )

    y_pad = pl.pallas_call(
        _fused_kernel,
        out_shape=jax.ShapeDtypeStruct((B_pad, n_out_pad), jnp.float32),
        grid_spec=grid_spec,
        compiler_params=pltpu.CompilerParams(
            dimension_semantics=("parallel", "arbitrary"),
            vmem_limit_bytes=vmem_limit_bytes,
        ),
    )(x2_p, xx_p, gam_p, gcn_p, Xall_p, Wall_p, bsum_p)

    return y_pad[:B, :n_out]


# ------------------------------- reference ----------------------------------

def _reference(x, X, W, b, sigma):
    """Pure-JAX reference of the same (sum-of-components) semantics."""
    out = jnp.zeros((x.shape[0], W.shape[1]), jnp.float32)
    hi = lax.Precision.HIGHEST
    for c in range(X.shape[0]):
        d2 = (jnp.sum(x * x, 1, keepdims=True)
              + jnp.sum(X[c] * X[c], 1)[None, :]
              - 2.0 * jnp.matmul(x, X[c].T, precision=hi))
        d2 = jnp.maximum(d2, 0.0)
        k = jnp.exp(-d2 / (2.0 * sigma[c] ** 2))
        out = out + jnp.matmul(k, W[c].T, precision=hi) + b[c][None, :]
    return out


if __name__ == "__main__":
    # Small deterministic shapes consistent with the module: C kFullyConnected
    # components, each with N centers of dim D mapping to n_out kernel machines.
    B, D, N, n_out, C = 8, 32, 16, 8, 3

    key = jax.random.PRNGKey(0)
    kx, kX, kW, kb = jax.random.split(key, 4)

    x = jax.random.normal(kx, (B, D), dtype=jnp.float32)
    X = jax.random.normal(kX, (C, N, D), dtype=jnp.float32)
    bound = 1.0 / jnp.sqrt(jnp.float32(N))          # nn.Linear default init scale
    W = jax.random.uniform(kW, (C, n_out, N), jnp.float32, -bound, bound)
    b = jax.random.uniform(kb, (C, n_out), jnp.float32, -bound, bound)
    # sigma ~ O(sqrt(D)) so Gaussian features are non-degenerate for N(0,1) data.
    sigma = jnp.array([5.0, 6.0, 7.0], dtype=jnp.float32)

    y_ref = _reference(x, X, W, b, sigma)

    # Fast path: bf16 MXU operands, f32 accumulation / elementwise.
    y = kernelized_layer_multi_comp(x, X, W, b, sigma)
    jax.block_until_ready(y)
    assert y.shape == (B, n_out)
    assert jnp.allclose(y, y_ref, atol=3e-2, rtol=3e-2), "bf16 kernel mismatch vs reference"

    # Full-precision path: tight correctness check of the fused kernel.
    y32 = kernelized_layer_multi_comp(x, X, W, b, sigma, compute_dtype=jnp.float32)
    jax.block_until_ready(y32)
    assert jnp.allclose(y32, y_ref, atol=5e-3, rtol=5e-3), "f32 kernel mismatch vs reference"

    print("KERNEL_OK")
</pallas_src>

<mosaic_0001>
module attributes {stable_mosaic.version = 11 : i64} {
  func.func @_fused_kernel(%arg0: i32, %arg1: i32, %arg2: memref<16x32xbf16, #tpu.memory_space<vmem>>, %arg3: memref<16x1xf32, #tpu.memory_space<vmem>>, %arg4: memref<1x128xf32, #tpu.memory_space<vmem>>, %arg5: memref<1x128xf32, #tpu.memory_space<vmem>>, %arg6: memref<128x32xbf16, #tpu.memory_space<vmem>>, %arg7: memref<128x128xbf16, #tpu.memory_space<vmem>>, %arg8: memref<1x128xf32, #tpu.memory_space<vmem>>, %arg9: memref<16x128xf32, #tpu.memory_space<vmem>>, %arg10: memref<16x128xf32, #tpu.memory_space<vmem>>) attributes {dimension_semantics = [#tpu.dimension_semantics<parallel>, #tpu.dimension_semantics<arbitrary>], iteration_bounds = array<i64: 1, 1>, scalar_prefetch = 0 : i64, scratch_operands = 1 : i64, tpu.core_type = #tpu.core_type<tc>, window_params = [{transform_indices = @transform_0, window_bounds = array<i64: 16, 32>}, {transform_indices = @transform_1, window_bounds = array<i64: 16, 1>}, {transform_indices = @transform_2, window_bounds = array<i64: 1, 128>}, {transform_indices = @transform_3, window_bounds = array<i64: 1, 128>}, {transform_indices = @transform_4, window_bounds = array<i64: 128, 32>}, {transform_indices = @transform_5, window_bounds = array<i64: 128, 128>}, {pipeline_mode = #tpu.pipeline_mode<synchronous>, transform_indices = @transform_6, window_bounds = array<i64: 1, 128>}, {transform_indices = @transform_7, window_bounds = array<i64: 16, 128>}]} {
    %c0_i32 = arith.constant 0 : i32
    %0 = arith.cmpi eq, %arg1, %c0_i32 : i32
    %1 = arith.extui %0 : i1 to i32
    %c0_i32_0 = arith.constant 0 : i32
    %2 = arith.cmpi ne, %1, %c0_i32_0 : i32
    scf.if %2 {
      %cst_20 = arith.constant 0.000000e+00 : f32
      %27 = vector.broadcast %cst_20 : f32 to vector<16x128xf32>
      %c0_21 = arith.constant 0 : index
      %c0_22 = arith.constant 0 : index
      %28 = vector.load %arg10[%c0_21, %c0_22] : memref<16x128xf32, #tpu.memory_space<vmem>>, vector<16x128xf32>
      tpu.vector_store %arg10[%c0_21, %c0_22], %27 {strides = array<i32>} : memref<16x128xf32, #tpu.memory_space<vmem>>, vector<16x128xf32>,
    } else {
    }
    %c0 = arith.constant 0 : index
    %c0_1 = arith.constant 0 : index
    %3 = vector.load %arg2[%c0, %c0_1] : memref<16x32xbf16, #tpu.memory_space<vmem>>, vector<16x32xbf16>
    %c0_2 = arith.constant 0 : index
    %c0_3 = arith.constant 0 : index
    %4 = vector.load %arg6[%c0_2, %c0_3] : memref<128x32xbf16, #tpu.memory_space<vmem>>, vector<128x32xbf16>
    %cst = arith.constant dense<0.000000e+00> : vector<16x128xf32>
    %5 = tpu.matmul %3, %4, %cst {dimension_numbers = #tpu.dot_dimension_numbers<[1], [1], [0], [0], [0, 0, 1, 0], [], []>} : vector<16x32xbf16>, vector<128x32xbf16>, vector<16x128xf32> -> vector<16x128xf32>
    %c0_4 = arith.constant 0 : index
    %c0_5 = arith.constant 0 : index
    %6 = vector.load %arg4[%c0_4, %c0_5] : memref<1x128xf32, #tpu.memory_space<vmem>>, vector<1x128xf32>
    %c0_6 = arith.constant 0 : index
    %c0_7 = arith.constant 0 : index
    %7 = vector.load %arg3[%c0_6, %c0_7] : memref<16x1xf32, #tpu.memory_space<vmem>>, vector<16x1xf32>
    %8 = vector.broadcast %7 : vector<16x1xf32> to vector<16x128xf32>
    %9 = arith.subf %5, %8 : vector<16x128xf32>
    %10 = vector.broadcast %6 : vector<1x128xf32> to vector<16x128xf32>
    %11 = arith.mulf %10, %9 : vector<16x128xf32>
    %c0_8 = arith.constant 0 : index
    %c0_9 = arith.constant 0 : index
    %12 = vector.load %arg5[%c0_8, %c0_9] : memref<1x128xf32, #tpu.memory_space<vmem>>, vector<1x128xf32>
    %13 = vector.broadcast %12 : vector<1x128xf32> to vector<16x128xf32>
    %14 = arith.subf %11, %13 : vector<16x128xf32>
    %cst_10 = arith.constant 0.000000e+00 : f32
    %15 = vector.broadcast %cst_10 : f32 to vector<16x128xf32>
    %16 = arith.minimumf %14, %15 : vector<16x128xf32>
    %17 = math.exp %16 : vector<16x128xf32>
    %c0_11 = arith.constant 0 : index
    %c0_12 = arith.constant 0 : index
    %18 = vector.load %arg10[%c0_11, %c0_12] : memref<16x128xf32, #tpu.memory_space<vmem>>, vector<16x128xf32>
    %19 = arith.truncf %17 : vector<16x128xf32> to vector<16x128xbf16>
    %c0_13 = arith.constant 0 : index
    %c0_14 = arith.constant 0 : index
    %20 = vector.load %arg7[%c0_13, %c0_14] : memref<128x128xbf16, #tpu.memory_space<vmem>>, vector<128x128xbf16>
    %cst_15 = arith.constant dense<0.000000e+00> : vector<16x128xf32>
    %21 = tpu.matmul %19, %20, %cst_15 {dimension_numbers = #tpu.dot_dimension_numbers<[1], [0], [0], [1], [0, 0, 1, 1], [], []>} : vector<16x128xbf16>, vector<128x128xbf16>, vector<16x128xf32> -> vector<16x128xf32>
    %22 = arith.addf %18, %21 : vector<16x128xf32>
    %c0_16 = arith.constant 0 : index
    %c0_17 = arith.constant 0 : index
    %23 = vector.load %arg10[%c0_16, %c0_17] : memref<16x128xf32, #tpu.memory_space<vmem>>, vector<16x128xf32>
    tpu.vector_store %arg10[%c0_16, %c0_17], %22 {strides = array<i32>} : memref<16x128xf32, #tpu.memory_space<vmem>>, vector<16x128xf32>,
    %c0_i32_18 = arith.constant 0 : i32
    %24 = arith.cmpi eq, %arg1, %c0_i32_18 : i32
    %25 = arith.extui %24 : i1 to i32
    %c0_i32_19 = arith.constant 0 : i32
    %26 = arith.cmpi ne, %25, %c0_i32_19 : i32
    scf.if %26 {
      %c0_20 = arith.constant 0 : index
      %c0_21 = arith.constant 0 : index
      %27 = vector.load %arg10[%c0_20, %c0_21] : memref<16x128xf32, #tpu.memory_space<vmem>>, vector<16x128xf32>
      %c0_22 = arith.constant 0 : index
      %c0_23 = arith.constant 0 : index
      %28 = vector.load %arg8[%c0_22, %c0_23] : memref<1x128xf32, #tpu.memory_space<vmem>>, vector<1x128xf32>
      %29 = vector.broadcast %28 : vector<1x128xf32> to vector<16x128xf32>
      %30 = arith.addf %27, %29 : vector<16x128xf32>
      %c0_24 = arith.constant 0 : index
      %c0_25 = arith.constant 0 : index
      %31 = vector.load %arg9[%c0_24, %c0_25] : memref<16x128xf32, #tpu.memory_space<vmem>>, vector<16x128xf32>
      tpu.vector_store %arg9[%c0_24, %c0_25], %30 {strides = array<i32>} : memref<16x128xf32, #tpu.memory_space<vmem>>, vector<16x128xf32>,
    } else {
    }
    return
  }
  func.func @transform_0(%arg0: i32, %arg1: i32) -> (i32, i32) {
    %c0_i32 = arith.constant 0 : i32
    %c0_i32_0 = arith.constant 0 : i32
    return %arg0, %c0_i32 : i32, i32
  }
  func.func @transform_1(%arg0: i32, %arg1: i32) -> (i32, i32) {
    %c0_i32 = arith.constant 0 : i32
    %c0_i32_0 = arith.constant 0 : i32
    return %arg0, %c0_i32 : i32, i32
  }
  func.func @transform_2(%arg0: i32, %arg1: i32) -> (i32, i32) {
    %c0_i32 = arith.constant 0 : i32
    %c0_i32_0 = arith.constant 0 : i32
    return %c0_i32, %arg1 : i32, i32
  }
  func.func @transform_3(%arg0: i32, %arg1: i32) -> (i32, i32) {
    %c0_i32 = arith.constant 0 : i32
    %c0_i32_0 = arith.constant 0 : i32
    return %c0_i32, %arg1 : i32, i32
  }
  func.func @transform_4(%arg0: i32, %arg1: i32) -> (i32, i32) {
    %c0_i32 = arith.constant 0 : i32
    %c0_i32_0 = arith.constant 0 : i32
    return %arg1, %c0_i32 : i32, i32
  }
  func.func @transform_5(%arg0: i32, %arg1: i32) -> (i32, i32) {
    %c0_i32 = arith.constant 0 : i32
    %c0_i32_0 = arith.constant 0 : i32
    return %arg1, %c0_i32 : i32, i32
  }
  func.func @transform_6(%arg0: i32, %arg1: i32) -> (i32, i32) {
    %c0_i32 = arith.constant 0 : i32
    %c0_i32_0 = arith.constant 0 : i32
    %c0_i32_1 = arith.constant 0 : i32
    return %c0_i32, %c0_i32_0 : i32, i32
  }
  func.func @transform_7(%arg0: i32, %arg1: i32) -> (i32, i32) {
    %c0_i32 = arith.constant 0 : i32
    %c0_i32_0 = arith.constant 0 : i32
    return %arg0, %c0_i32 : i32, i32
  }
}

</mosaic_0001>

<bundles_post_ra>
// kernel: tpu_custom_call.1
= control target key start
LH: loop header
LB: loop body
LE: loop exit
PB: predicated region body
PF: predicated region fallthrough
CT: control target
= control target key end

     0   :  { %vm96_vm0 = vcmask 261120   ;;  %s532_s0 = inlined_call_operand.vmem [shape: bf16[16,32], index: 0, kind: input, shape index: {}]   ;;  %s533_s1 = inlined_call_operand.vmem [shape: f32[16,1], index: 1, kind: input, shape index: {}]   ;;  %s534_s2 = inlined_call_operand.vmem [shape: f32[1,128], index: 2, kind: input, shape index: {}]   ;;  %s535_s3 = inlined_call_operand.vmem [shape: f32[1,128], index: 3, kind: input, shape index: {}]   ;;  %s536_s4 = inlined_call_operand.vmem [shape: bf16[128,32], index: 4, kind: input, shape index: {}]   ;;  %s537_s5 = inlined_call_operand.vmem [shape: bf16[128,128], index: 5, kind: input, shape index: {}]   ;;  %s538_s6 = inlined_call_operand.vmem [shape: f32[1,128], index: 6, kind: input, shape index: {}]   ;;  %s539_s7 = inlined_call_operand.hbm [shape: f32[16,128], index: 7, kind: output, shape index: {}]  }
   0x1   :  { %v363_v0 = vld [vmem:[%s536_s4 + $0x38] sm:$0xff]  ;;  %v362_v2 = vld [vmem:[%s536_s4 + $0x30] sm:$0xff] }
   0x2   :  { %v122_v1 = vsel %vm96_vm0, %v363_v0, 0 }
   0x3   :  { %124 = vmatpush.bf16.xpose.msra.mxu0 %v122_v1 }
   0x4   :  { %12 = vsyncpa [#allocation4], 0  ;;  %v119_v3 = vsel %vm96_vm0, %v362_v2, 0  ;;  %v361_v4 = vld [vmem:[%s536_s4 + $0x28] sm:$0xff]  ;;  %v360_v6 = vld [vmem:[%s536_s4 + $0x20] sm:$0xff]  ;;  %v410_v11 = vmov 0  }
   0x5   :  { %v116_v5 = vsel %vm96_vm0, %v361_v4, 0  ;;  %v113_v7 = vsel %vm96_vm0, %v360_v6, 0  ;;  %v359_v8 = vld [vmem:[%s536_s4 + $0x18] sm:$0xff]  ;;  %v139_v10 = vld [vmem:[%s533_s1] sm:$0xff]  ;;  %376 = vset.pattern.permute.xlu0 %v410_v11  ;;  %v358_v12 = vld [vmem:[%s536_s4 + $0x10] sm:$0xff]  ;;  %s274_s20 = sshll.u32 %s539_s7, 4  ;;  %s275_s20 = int_to_ptr.hbm [resolvable:$true] %s274_s20 }
   0x6   :  { %v110_v9 = vsel %vm96_vm0, %v359_v8, 0  ;;  %143 = vperm.xlu0 %376, %v139_v10   ;;  %v107_v13 = vsel %vm96_vm0, %v358_v12, 0  ;;  %v140_v14 = vld [vmem:[%s533_s1 + $0x8] sm:$0xff]  ;;  %v356_v17 = vld [vmem:[%s536_s4] sm:$0xff]  ;;  %v371_v20 = vld [vmem:[%s537_s5 + $0x38] sm:$0xff]  ;;  %s412_s21 = smov 128  }
   0x7   :  { %v357_v15 = vld [vmem:[%s536_s4 + $0x8] sm:$0xff]  ;;  %v101_v18 = vsel %vm96_vm0, %v356_v17, 0  ;;  %v355_v19 = vld [vmem:[%s532_s0] sm:$0xff]  ;;  %237 = vmatpush.bf16.msra.mxu1 %v371_v20  ;;  %v370_v21 = vld [vmem:[%s537_s5 + $0x30] sm:$0xff]  ;;  %s413_s22 = smov 8  }
   0x8   :  { %v104_v16 = vsel %vm96_vm0, %v357_v15, 0  ;;  %v369_v22 = vld [vmem:[%s537_s5 + $0x28] sm:$0xff]  ;;  %v368_v23 = vld [vmem:[%s537_s5 + $0x20] sm:$0xff]  ;;  %v367_v24 = vld [vmem:[%s537_s5 + $0x18] sm:$0xff] }
   0x9   :  { %v366_v25 = vld [vmem:[%s537_s5 + $0x10] sm:$0xff]  ;;  %v365_v26 = vld [vmem:[%s537_s5 + $0x8] sm:$0xff]  ;;  %v364_v27 = vld [vmem:[%s537_s5] sm:$0xff] }
   0xa   :  { %v377_v29 = vld [vmem:[%s534_s2] ss:$0 sm:$0xff] }
   0xb   :  { %125 = vmatpush.bf16.xpose.msra.mxu0 %v119_v3  ;;  %238 = vmatpush.bf16.msra.mxu1 %v370_v21  ;;  %v378_v32 = vld [vmem:[%s535_s3] ss:$0 sm:$0xff]  ;;  %s411_s3 = smov [#allocation3]  }
   0xc   :  { %v379_v47 = vld [vmem:[%s538_s6] ss:$0 sm:$0xff]  ;;  %s272_s17 = sshll.u32 %s411_s3, 4  ;;  %s273_s17 = int_to_ptr.vmem [resolvable:$true] %s272_s17 }
   0xe   :  { %148 = vperm.xlu0 %376, %v140_v14  }
   0xf   :  { %239 = vmatpush.bf16.msra.mxu1 %v369_v22 }
  0x13   :  { %126 = vmatpush.bf16.xpose.msra.mxu0 %v116_v5  ;;  %240 = vmatpush.bf16.msra.mxu1 %v368_v23 }
  0x17   :  { %241 = vmatpush.bf16.msra.mxu1 %v367_v24 }
  0x1b   :  { %127 = vmatpush.bf16.xpose.msra.mxu0 %v113_v7  ;;  %242 = vmatpush.bf16.msra.mxu1 %v366_v25 }
  0x1f   :  { %243 = vmatpush.bf16.msra.mxu1 %v365_v26 }
  0x23   :  { %128 = vmatpush.bf16.xpose.msra.mxu0 %v110_v9  ;;  %244 = vmatpush.bf16.msra.mxu1 %v364_v27 }
  0x2b   :  { %129 = vmatpush.bf16.xpose.msra.mxu0 %v107_v13 }
  0x33   :  { %130 = vmatpush.bf16.xpose.msra.mxu0 %v104_v16 }
  0x3b   :  { %131 = vmatpush.bf16.xpose.msra.mxu0 %v101_v18 }
  0x42   :  { %322 = vmatmul.msk.bf16.vlgmr.msra.gmra.mxu0 %vm96_vm0, %v355_v19 }
  0x78   :  { %v144_v28 = vpop.permute.xlu0 %143 }
  0x80   :  { %v149_v35 = vpop.permute.xlu0 %148 }
  0xbf   :  { %v133_v30 = vpop.f32.mrf.mxu0 }
  0xc0   :  { %v151_v31 = vsub.f32 %v133_v30, %v144_v28 }
  0xc2   :  { %v156_v33 = vmul.f32 %v377_v29, %v151_v31 }
  0xc4   :  { %v162_v34 = vsub.f32 %v156_v33, %v378_v32 }
  0xc6   :  { %v164_v38 = vmin.f32 %v162_v34, 0.0 }
  0xc7   :  { %v135_v36 = vpop.f32.mrf.mxu0 }
  0xc8   :  { %v152_v37 = vsub.f32 %v135_v36, %v149_v35  ;;  %v166_v41 = vmul.f32 1.442695, %v164_v38 }
  0xca   :  { %v157_v39 = vmul.f32 %v377_v29, %v152_v37  ;;  %380 = vpow2.f32 %v166_v41 }
  0xcc   :  { %v163_v40 = vsub.f32 %v157_v39, %v378_v32 }
  0xce   :  { %v165_v42 = vmin.f32 %v163_v40, 0.0 }
  0xd0   :  { %v168_v43 = vmul.f32 1.442695, %v165_v42  ;;  %v381_v44 = vpop.eup %380 }
  0xd2   :  { %382 = vpow2.f32 %v168_v43 }
  0xd8   :  { %v383_v45 = vpop.eup %382 }
  0xd9   :  { %v172_v46 = vpack.c.bf16 %v383_v45, %v381_v44 }
  0xdb   :  { %245 = vmatmul.bf16.vlgmr.msra.gmra.mxu1 %v172_v46 }
 0x158   :  { %v246_v48 = vpop.f32.mrf.mxu1 }
 0x159   :  { %v264_v49 = vadd.f32 %v379_v47, %v246_v48 }
 0x15b   :  { %266 = vst [vmem:[#allocation3] sm:$0xff] %v264_v49 }
 0x160   :  { %v248_v50 = vpop.f32.mrf.mxu1 }
 0x161   :  { %v265_v51 = vadd.f32 %v379_v47, %v248_v50 }
 0x163   :  { %267 = vst [vmem:[#allocation3 + $0x8] sm:$0xff] %v265_v51 }
 0x164   :  { %280 = dma.vmem_to_hbm [thread:$0]  %s273_s17, 256, %s275_s20, [#allocation4], %s412_s21, %s412_s21, %s413_s22  }
 0x165   :  { %408 = dma.done.wait [#allocation4], 256  }
 0x166   :  { %409 = vsyncadd [#allocation4], 4294967040 }
 0x167   :  { %285 = vsyncpa [#allocation4], 1 }

</bundles_post_ra>
